<compile_context>
chip_gen: v5e
topology: v5e:2x2
jax: 0.10.0
libtpu: 0.0.40
codegen_flags: <defaults>
</compile_context>

<pallas_src>
import jax
import jax.numpy as jnp
from jax.experimental import pallas as pl
from jax.experimental.pallas import tpu as pltpu  # noqa: F401  (kept for CompilerParams if scaled up)

BN_EPS = 1e-5


def _full_spec(shape):
    """Whole-array block (no grid) — block equals the full array, so the (8,128)
    divisibility constraint does not apply."""
    nd = len(shape)
    return pl.BlockSpec(shape, lambda *args: (0,) * nd)


# ---------------------------------------------------------------------------
# Single fused kernel: [Linear -> ReLU -> BN] * n_blocks  ->  Linear_out
# ---------------------------------------------------------------------------
def make_classifier_kernel(n_blocks):
    """n_blocks = n_layers + 1 (the reduction block counts as the last block).

    Ref layout (positional):
      x_ref,
      [w, b, gamma, beta] * n_blocks,      # per fused Linear+ReLU+BN block
      w_out, b_out,                        # final classification Linear
      cls_ref, red_ref                     # outputs: labels_hat, reduction-layer h
    """

    def kernel(*refs):
        x_ref = refs[0]
        param_refs = refs[1 : 1 + 4 * n_blocks + 2]
        cls_ref, red_ref = refs[1 + 4 * n_blocks + 2 :]

        h = x_ref[...].astype(jnp.float32)
        idx = 0
        for _ in range(n_blocks):
            w = param_refs[idx][...].astype(jnp.float32)       # (Din, Dout)
            b = param_refs[idx + 1][...]                        # (1, Dout)
            g = param_refs[idx + 2][...]                        # (1, Dout)
            be = param_refs[idx + 3][...]                       # (1, Dout)
            idx += 4
            # Linear + bias (MXU, f32 accumulate)
            h = jnp.dot(h, w, preferred_element_type=jnp.float32) + b
            # ReLU
            h = jnp.maximum(h, 0.0)
            # BatchNorm1d, training mode: biased batch statistics over the batch axis
            mean = jnp.mean(h, axis=0, keepdims=True)
            centered = h - mean
            var = jnp.mean(centered * centered, axis=0, keepdims=True)
            h = g * centered * jax.lax.rsqrt(var + BN_EPS) + be

        # Final classification layer (no activation / BN)
        w_out = param_refs[idx][...].astype(jnp.float32)        # (n_red, n_classes)
        b_out = param_refs[idx + 1][...]                         # (1, n_classes)
        red_ref[...] = h.astype(red_ref.dtype)
        cls_ref[...] = (
            jnp.dot(h, w_out, preferred_element_type=jnp.float32) + b_out
        ).astype(cls_ref.dtype)

    return kernel


# ---------------------------------------------------------------------------
# Wrapper: one pallas_call for the whole forward
# ---------------------------------------------------------------------------
def classifier_forward(params, x, is_z=True):
    """Returns (labels_hat, input, dummy, input) for is_z=True,
    (labels_hat, input, dummy, reduction_layer) for is_z=False —
    matching the PyTorch module's forward()."""
    B = x.shape[0]
    blocks = params["blocks"]            # list of (w, b, gamma, beta), w: (Din, Dout)
    w_out, b_out = params["out"]
    n_blocks = len(blocks)

    flat_params = []
    for (w, b, g, be) in blocks:
        dout = w.shape[1]
        flat_params += [w, b.reshape(1, dout), g.reshape(1, dout), be.reshape(1, dout)]
    flat_params += [w_out, b_out.reshape(1, w_out.shape[1])]

    n_classes = w_out.shape[1]
    n_red = blocks[-1][0].shape[1]

    in_specs = [_full_spec(x.shape)] + [_full_spec(p.shape) for p in flat_params]

    cls, red = pl.pallas_call(
        make_classifier_kernel(n_blocks),
        out_shape=(
            jax.ShapeDtypeStruct((B, n_classes), jnp.float32),
            jax.ShapeDtypeStruct((B, n_red), jnp.float32),
        ),
        in_specs=in_specs,
        out_specs=(_full_spec((B, n_classes)), _full_spec((B, n_red))),
    )(x, *flat_params)

    dummy = jnp.zeros((0,), jnp.float32)   # torch.Tensor([]) analogue
    if is_z:
        return (cls, x, dummy, x)
    return (cls, x, dummy, red)


# ---------------------------------------------------------------------------
# Parameter construction (matches PyTorch layer shapes / default init)
# ---------------------------------------------------------------------------
def make_params(key, n_input_layer, factor, n_classes, n_layers, n_reduction_layer):
    def linear(k, din, dout):
        kw, kb = jax.random.split(k)
        bound = 1.0 / (din ** 0.5)
        w = jax.random.uniform(kw, (din, dout), jnp.float32, -bound, bound)  # (Din,Dout)
        b = jax.random.uniform(kb, (dout,), jnp.float32, -bound, bound)
        return w, b

    dims = [int(n_input_layer * factor ** c) for c in range(0, n_layers + 1)]
    keys = jax.random.split(key, n_layers + 2)

    blocks = []
    for cur in range(1, n_layers + 1):
        din, dout = dims[cur - 1], dims[cur]
        w, b = linear(keys[cur - 1], din, dout)
        blocks.append((w, b, jnp.ones((dout,), jnp.float32), jnp.zeros((dout,), jnp.float32)))

    # fc_cls_reduction + fc_bn_cls_reduction
    w, b = linear(keys[n_layers], dims[-1], n_reduction_layer)
    blocks.append(
        (w, b, jnp.ones((n_reduction_layer,), jnp.float32), jnp.zeros((n_reduction_layer,), jnp.float32))
    )

    # fc_cls_out
    w_out, b_out = linear(keys[n_layers + 1], n_reduction_layer, n_classes)
    return {"blocks": blocks, "out": (w_out, b_out)}


if __name__ == "__main__":
    # Small shapes consistent with the module:
    # n_input_layer=32, factor=0.5, n_layers=2  ->  32 -> 16 -> 8 -> n_reduction_layer=2 -> n_classes=16
    B = 8
    n_input_layer = 32
    factor = 0.5
    n_classes = 16
    n_layers = 2
    n_reduction_layer = 2

    key = jax.random.PRNGKey(0)
    k_params, k_x = jax.random.split(key)

    params = make_params(k_params, n_input_layer, factor, n_classes, n_layers, n_reduction_layer)
    x = jax.random.normal(k_x, (B, n_input_layer), jnp.float32)

    labels_hat, inp_out, dummy, fourth = classifier_forward(params, x, is_z=True)
    jax.block_until_ready((labels_hat, inp_out, dummy, fourth))

    assert labels_hat.shape == (B, n_classes)
    assert inp_out.shape == (B, n_input_layer)
    assert dummy.shape == (0,)
    assert fourth.shape == (B, n_input_layer)
    assert bool(jnp.all(jnp.isfinite(labels_hat)))
    print("KERNEL_OK")
</pallas_src>

<mosaic_0001>
module attributes {stable_mosaic.version = 11 : i64} {
  func.func @kernel(%arg0: memref<8x32xf32, #tpu.memory_space<vmem>>, %arg1: memref<32x16xf32, #tpu.memory_space<vmem>>, %arg2: memref<1x16xf32, #tpu.memory_space<vmem>>, %arg3: memref<1x16xf32, #tpu.memory_space<vmem>>, %arg4: memref<1x16xf32, #tpu.memory_space<vmem>>, %arg5: memref<16x8xf32, #tpu.memory_space<vmem>>, %arg6: memref<1x8xf32, #tpu.memory_space<vmem>>, %arg7: memref<1x8xf32, #tpu.memory_space<vmem>>, %arg8: memref<1x8xf32, #tpu.memory_space<vmem>>, %arg9: memref<8x2xf32, #tpu.memory_space<vmem>>, %arg10: memref<1x2xf32, #tpu.memory_space<vmem>>, %arg11: memref<1x2xf32, #tpu.memory_space<vmem>>, %arg12: memref<1x2xf32, #tpu.memory_space<vmem>>, %arg13: memref<2x16xf32, #tpu.memory_space<vmem>>, %arg14: memref<1x16xf32, #tpu.memory_space<vmem>>, %arg15: memref<8x16xf32, #tpu.memory_space<vmem>>, %arg16: memref<8x2xf32, #tpu.memory_space<vmem>>) attributes {dimension_semantics = [], scalar_prefetch = 0 : i64, scratch_operands = 0 : i64, tpu.core_type = #tpu.core_type<tc>} {
    %c0 = arith.constant 0 : index
    %c0_0 = arith.constant 0 : index
    %0 = vector.load %arg0[%c0, %c0_0] : memref<8x32xf32, #tpu.memory_space<vmem>>, vector<8x32xf32>
    %c0_1 = arith.constant 0 : index
    %c0_2 = arith.constant 0 : index
    %1 = vector.load %arg1[%c0_1, %c0_2] : memref<32x16xf32, #tpu.memory_space<vmem>>, vector<32x16xf32>
    %c0_3 = arith.constant 0 : index
    %c0_4 = arith.constant 0 : index
    %2 = vector.load %arg2[%c0_3, %c0_4] : memref<1x16xf32, #tpu.memory_space<vmem>>, vector<1x16xf32>
    %c0_5 = arith.constant 0 : index
    %c0_6 = arith.constant 0 : index
    %3 = vector.load %arg3[%c0_5, %c0_6] : memref<1x16xf32, #tpu.memory_space<vmem>>, vector<1x16xf32>
    %c0_7 = arith.constant 0 : index
    %c0_8 = arith.constant 0 : index
    %4 = vector.load %arg4[%c0_7, %c0_8] : memref<1x16xf32, #tpu.memory_space<vmem>>, vector<1x16xf32>
    %cst = arith.constant dense<0.000000e+00> : vector<8x16xf32>
    %5 = tpu.matmul %0, %1, %cst {dimension_numbers = #tpu.dot_dimension_numbers<[1], [0], [0], [1], [0, 0, 1, 1], [], []>} : vector<8x32xf32>, vector<32x16xf32>, vector<8x16xf32> -> vector<8x16xf32>
    %6 = vector.broadcast %2 : vector<1x16xf32> to vector<8x16xf32>
    %7 = arith.addf %5, %6 : vector<8x16xf32>
    %cst_9 = arith.constant 0.000000e+00 : f32
    %8 = vector.broadcast %cst_9 : f32 to vector<8x16xf32>
    %9 = arith.maximumf %7, %8 : vector<8x16xf32>
    %cst_10 = arith.constant dense<0.000000e+00> : vector<16xf32>
    %10 = vector.multi_reduction <add>, %9, %cst_10 [0] : vector<8x16xf32> to vector<16xf32>
    %11 = vector.shape_cast %10 : vector<16xf32> to vector<1x16xf32>
    %cst_11 = arith.constant 8.000000e+00 : f32
    %12 = vector.broadcast %cst_11 : f32 to vector<1x16xf32>
    %13 = arith.divf %11, %12 : vector<1x16xf32>
    %14 = vector.broadcast %13 : vector<1x16xf32> to vector<8x16xf32>
    %15 = arith.subf %9, %14 : vector<8x16xf32>
    %16 = arith.mulf %15, %15 : vector<8x16xf32>
    %cst_12 = arith.constant dense<0.000000e+00> : vector<16xf32>
    %17 = vector.multi_reduction <add>, %16, %cst_12 [0] : vector<8x16xf32> to vector<16xf32>
    %18 = vector.shape_cast %17 : vector<16xf32> to vector<1x16xf32>
    %cst_13 = arith.constant 8.000000e+00 : f32
    %19 = vector.broadcast %cst_13 : f32 to vector<1x16xf32>
    %20 = arith.divf %18, %19 : vector<1x16xf32>
    %21 = vector.broadcast %3 : vector<1x16xf32> to vector<8x16xf32>
    %22 = arith.mulf %21, %15 : vector<8x16xf32>
    %cst_14 = arith.constant 9.99999974E-6 : f32
    %23 = vector.broadcast %cst_14 : f32 to vector<1x16xf32>
    %24 = arith.addf %20, %23 : vector<1x16xf32>
    %25 = math.rsqrt %24 : vector<1x16xf32>
    %26 = vector.broadcast %25 : vector<1x16xf32> to vector<8x16xf32>
    %27 = arith.mulf %22, %26 : vector<8x16xf32>
    %28 = vector.broadcast %4 : vector<1x16xf32> to vector<8x16xf32>
    %29 = arith.addf %27, %28 : vector<8x16xf32>
    %c0_15 = arith.constant 0 : index
    %c0_16 = arith.constant 0 : index
    %30 = vector.load %arg5[%c0_15, %c0_16] : memref<16x8xf32, #tpu.memory_space<vmem>>, vector<16x8xf32>
    %c0_17 = arith.constant 0 : index
    %c0_18 = arith.constant 0 : index
    %31 = vector.load %arg6[%c0_17, %c0_18] : memref<1x8xf32, #tpu.memory_space<vmem>>, vector<1x8xf32>
    %c0_19 = arith.constant 0 : index
    %c0_20 = arith.constant 0 : index
    %32 = vector.load %arg7[%c0_19, %c0_20] : memref<1x8xf32, #tpu.memory_space<vmem>>, vector<1x8xf32>
    %c0_21 = arith.constant 0 : index
    %c0_22 = arith.constant 0 : index
    %33 = vector.load %arg8[%c0_21, %c0_22] : memref<1x8xf32, #tpu.memory_space<vmem>>, vector<1x8xf32>
    %cst_23 = arith.constant dense<0.000000e+00> : vector<8x8xf32>
    %34 = tpu.matmul %29, %30, %cst_23 {dimension_numbers = #tpu.dot_dimension_numbers<[1], [0], [0], [1], [0, 0, 1, 1], [], []>} : vector<8x16xf32>, vector<16x8xf32>, vector<8x8xf32> -> vector<8x8xf32>
    %35 = vector.broadcast %31 : vector<1x8xf32> to vector<8x8xf32>
    %36 = arith.addf %34, %35 : vector<8x8xf32>
    %cst_24 = arith.constant 0.000000e+00 : f32
    %37 = vector.broadcast %cst_24 : f32 to vector<8x8xf32>
    %38 = arith.maximumf %36, %37 : vector<8x8xf32>
    %cst_25 = arith.constant dense<0.000000e+00> : vector<8xf32>
    %39 = vector.multi_reduction <add>, %38, %cst_25 [0] : vector<8x8xf32> to vector<8xf32>
    %40 = vector.shape_cast %39 : vector<8xf32> to vector<1x8xf32>
    %cst_26 = arith.constant 8.000000e+00 : f32
    %41 = vector.broadcast %cst_26 : f32 to vector<1x8xf32>
    %42 = arith.divf %40, %41 : vector<1x8xf32>
    %43 = vector.broadcast %42 : vector<1x8xf32> to vector<8x8xf32>
    %44 = arith.subf %38, %43 : vector<8x8xf32>
    %45 = arith.mulf %44, %44 : vector<8x8xf32>
    %cst_27 = arith.constant dense<0.000000e+00> : vector<8xf32>
    %46 = vector.multi_reduction <add>, %45, %cst_27 [0] : vector<8x8xf32> to vector<8xf32>
    %47 = vector.shape_cast %46 : vector<8xf32> to vector<1x8xf32>
    %cst_28 = arith.constant 8.000000e+00 : f32
    %48 = vector.broadcast %cst_28 : f32 to vector<1x8xf32>
    %49 = arith.divf %47, %48 : vector<1x8xf32>
    %50 = vector.broadcast %32 : vector<1x8xf32> to vector<8x8xf32>
    %51 = arith.mulf %50, %44 : vector<8x8xf32>
    %cst_29 = arith.constant 9.99999974E-6 : f32
    %52 = vector.broadcast %cst_29 : f32 to vector<1x8xf32>
    %53 = arith.addf %49, %52 : vector<1x8xf32>
    %54 = math.rsqrt %53 : vector<1x8xf32>
    %55 = vector.broadcast %54 : vector<1x8xf32> to vector<8x8xf32>
    %56 = arith.mulf %51, %55 : vector<8x8xf32>
    %57 = vector.broadcast %33 : vector<1x8xf32> to vector<8x8xf32>
    %58 = arith.addf %56, %57 : vector<8x8xf32>
    %c0_30 = arith.constant 0 : index
    %c0_31 = arith.constant 0 : index
    %59 = vector.load %arg9[%c0_30, %c0_31] : memref<8x2xf32, #tpu.memory_space<vmem>>, vector<8x2xf32>
    %c0_32 = arith.constant 0 : index
    %c0_33 = arith.constant 0 : index
    %60 = vector.load %arg10[%c0_32, %c0_33] : memref<1x2xf32, #tpu.memory_space<vmem>>, vector<1x2xf32>
    %c0_34 = arith.constant 0 : index
    %c0_35 = arith.constant 0 : index
    %61 = vector.load %arg11[%c0_34, %c0_35] : memref<1x2xf32, #tpu.memory_space<vmem>>, vector<1x2xf32>
    %c0_36 = arith.constant 0 : index
    %c0_37 = arith.constant 0 : index
    %62 = vector.load %arg12[%c0_36, %c0_37] : memref<1x2xf32, #tpu.memory_space<vmem>>, vector<1x2xf32>
    %cst_38 = arith.constant dense<0.000000e+00> : vector<8x2xf32>
    %63 = tpu.matmul %58, %59, %cst_38 {dimension_numbers = #tpu.dot_dimension_numbers<[1], [0], [0], [1], [0, 0, 1, 1], [], []>} : vector<8x8xf32>, vector<8x2xf32>, vector<8x2xf32> -> vector<8x2xf32>
    %64 = vector.broadcast %60 : vector<1x2xf32> to vector<8x2xf32>
    %65 = arith.addf %63, %64 : vector<8x2xf32>
    %cst_39 = arith.constant 0.000000e+00 : f32
    %66 = vector.broadcast %cst_39 : f32 to vector<8x2xf32>
    %67 = arith.maximumf %65, %66 : vector<8x2xf32>
    %cst_40 = arith.constant dense<0.000000e+00> : vector<2xf32>
    %68 = vector.multi_reduction <add>, %67, %cst_40 [0] : vector<8x2xf32> to vector<2xf32>
    %69 = vector.shape_cast %68 : vector<2xf32> to vector<1x2xf32>
    %cst_41 = arith.constant 8.000000e+00 : f32
    %70 = vector.broadcast %cst_41 : f32 to vector<1x2xf32>
    %71 = arith.divf %69, %70 : vector<1x2xf32>
    %72 = vector.broadcast %71 : vector<1x2xf32> to vector<8x2xf32>
    %73 = arith.subf %67, %72 : vector<8x2xf32>
    %74 = arith.mulf %73, %73 : vector<8x2xf32>
    %cst_42 = arith.constant dense<0.000000e+00> : vector<2xf32>
    %75 = vector.multi_reduction <add>, %74, %cst_42 [0] : vector<8x2xf32> to vector<2xf32>
    %76 = vector.shape_cast %75 : vector<2xf32> to vector<1x2xf32>
    %cst_43 = arith.constant 8.000000e+00 : f32
    %77 = vector.broadcast %cst_43 : f32 to vector<1x2xf32>
    %78 = arith.divf %76, %77 : vector<1x2xf32>
    %79 = vector.broadcast %61 : vector<1x2xf32> to vector<8x2xf32>
    %80 = arith.mulf %79, %73 : vector<8x2xf32>
    %cst_44 = arith.constant 9.99999974E-6 : f32
    %81 = vector.broadcast %cst_44 : f32 to vector<1x2xf32>
    %82 = arith.addf %78, %81 : vector<1x2xf32>
    %83 = math.rsqrt %82 : vector<1x2xf32>
    %84 = vector.broadcast %83 : vector<1x2xf32> to vector<8x2xf32>
    %85 = arith.mulf %80, %84 : vector<8x2xf32>
    %86 = vector.broadcast %62 : vector<1x2xf32> to vector<8x2xf32>
    %87 = arith.addf %85, %86 : vector<8x2xf32>
    %c0_45 = arith.constant 0 : index
    %c0_46 = arith.constant 0 : index
    %88 = vector.load %arg13[%c0_45, %c0_46] : memref<2x16xf32, #tpu.memory_space<vmem>>, vector<2x16xf32>
    %c0_47 = arith.constant 0 : index
    %c0_48 = arith.constant 0 : index
    %89 = vector.load %arg14[%c0_47, %c0_48] : memref<1x16xf32, #tpu.memory_space<vmem>>, vector<1x16xf32>
    %c0_49 = arith.constant 0 : index
    %c0_50 = arith.constant 0 : index
    %90 = vector.load %arg16[%c0_49, %c0_50] : memref<8x2xf32, #tpu.memory_space<vmem>>, vector<8x2xf32>
    tpu.vector_store %arg16[%c0_49, %c0_50], %87 {strides = array<i32>} : memref<8x2xf32, #tpu.memory_space<vmem>>, vector<8x2xf32>,
    %cst_51 = arith.constant dense<0.000000e+00> : vector<8x16xf32>
    %91 = tpu.matmul %87, %88, %cst_51 {dimension_numbers = #tpu.dot_dimension_numbers<[1], [0], [0], [1], [0, 0, 1, 1], [], []>} : vector<8x2xf32>, vector<2x16xf32>, vector<8x16xf32> -> vector<8x16xf32>
    %92 = vector.broadcast %89 : vector<1x16xf32> to vector<8x16xf32>
    %93 = arith.addf %91, %92 : vector<8x16xf32>
    %c0_52 = arith.constant 0 : index
    %c0_53 = arith.constant 0 : index
    %94 = vector.load %arg15[%c0_52, %c0_53] : memref<8x16xf32, #tpu.memory_space<vmem>>, vector<8x16xf32>
    tpu.vector_store %arg15[%c0_52, %c0_53], %93 {strides = array<i32>} : memref<8x16xf32, #tpu.memory_space<vmem>>, vector<8x16xf32>,
    return
  }
}

</mosaic_0001>

<bundles_post_ra>
// kernel: tpu_custom_call.1
= control target key start
LH: loop header
LB: loop body
LE: loop exit
PB: predicated region body
PF: predicated region fallthrough
CT: control target
= control target key end

     0   :  { %s550_s0 = inlined_call_operand.vmem [shape: f32[8,32], index: 0, kind: input, shape index: {}]   ;;  %s551_s1 = inlined_call_operand.vmem [shape: f32[32,16], index: 1, kind: input, shape index: {}]   ;;  %s552_s2 = inlined_call_operand.vmem [shape: f32[1,16], index: 2, kind: input, shape index: {}]   ;;  %s553_s3 = inlined_call_operand.vmem [shape: f32[1,16], index: 3, kind: input, shape index: {}]   ;;  %s554_s4 = inlined_call_operand.vmem [shape: f32[1,16], index: 4, kind: input, shape index: {}]   ;;  %s555_s5 = inlined_call_operand.vmem [shape: f32[16,8], index: 5, kind: input, shape index: {}]   ;;  %s556_s6 = inlined_call_operand.vmem [shape: f32[1,8], index: 6, kind: input, shape index: {}]   ;;  %s557_s7 = inlined_call_operand.vmem [shape: f32[1,8], index: 7, kind: input, shape index: {}]   ;;  %s558_s8 = inlined_call_operand.vmem [shape: f32[1,8], index: 8, kind: input, shape index: {}]   ;;  %s559_s9 = inlined_call_operand.vmem [shape: f32[8,2], index: 9, kind: input, shape index: {}]   ;;  %s560_s10 = inlined_call_operand.vmem [shape: f32[1,2], index: 10, kind: input, shape index: {}]   ;;  %s561_s11 = inlined_call_operand.vmem [shape: f32[1,2], index: 11, kind: input, shape index: {}]   ;;  %s562_s12 = inlined_call_operand.vmem [shape: f32[1,2], index: 12, kind: input, shape index: {}]   ;;  %s563_s13 = inlined_call_operand.vmem [shape: f32[2,16], index: 13, kind: input, shape index: {}]   ;;  %s564_s14 = inlined_call_operand.vmem [shape: f32[1,16], index: 14, kind: input, shape index: {}]   ;;  %s565_s15 = inlined_call_operand.hbm [shape: f32[8,16], index: 15, kind: output, shape index: {0}]   ;;  %s566_s16 = inlined_call_operand.vmem [shape: f32[8,2], index: 16, kind: output, shape index: {1}]  }
   0x1   :  { %567 = sst [smem:[#allocation5_spill]] %s550_s0 }
   0x2   :  { %v57_v0 = vld [vmem:[%s551_s1 + $0x18] sm:$0xff]  ;;  %v56_v1 = vld [vmem:[%s551_s1 + $0x10] sm:$0xff]  ;;  %v55_v2 = vld [vmem:[%s551_s1 + $0x8] sm:$0xff]  ;;  %s568_s0 = sld [smem:[#allocation5_spill]]  ;;  %vm64_vm0 = vcmask 261120  }
   0x3   :  { %80 = vmatpush.msra.mxu0 %v57_v0  ;;  %v54_v3 = vld [vmem:[%s551_s1] sm:$0xff] }
   0x5   :  { %81 = vmatpush.msra.mxu0 %v56_v1 }
   0x7   :  { %82 = vmatpush.msra.mxu0 %v55_v2 }
   0x8   :  { %v53_v4 = vld [vmem:[%s568_s0] sm:$0xff] }
   0x9   :  { %22 = vsyncpa [#allocation3], 0  ;;  %83 = vmatpush.msra.mxu0 %v54_v3  ;;  %v381_v5 = vmov 8.0   ;;  %v337_v7 = vld [vmem:[%s552_s2] ss:$0 sm:$0xff]  ;;  %vm89_vm1 = vcmask 130048  }
   0xa   :  { %330 = vmatmul.msk.f32.vlgmr.msra.gmra.mxu0 %vm64_vm0, %v53_v4  ;;  %347 = vrcp.f32 %v381_v5  ;;  %v136_v17 = vld [vmem:[%s555_s5 + $0x8] sm:$0xff]  ;;  %v135_v18 = vld [vmem:[%s555_s5] sm:$0xff]  ;;  %vm167_vm6 = vcmask 64512   ;;  %vm237_vm10 = vcmask 15360   ;;  %vm285_vm11 = vcmask 1041408   ;;  %s382_s19 = smov [#allocation2]  }
   0xb   :  { %160 = vmatpush.msra.mxu1 %v136_v17  ;;  %v338_v41 = vld [vmem:[%s553_s3] ss:$0 sm:$0xff]  ;;  %s315_s20 = sshll.u32 %s382_s19, 4  ;;  %s316_s20 = int_to_ptr.vmem [resolvable:$true] %s315_s20 }
   0xc   :  { %v339_v45 = vld [vmem:[%s554_s4] ss:$0 sm:$0xff] }
   0xd   :  { %161 = vmatpush.msra.mxu1 %v135_v18  ;;  %v206_v49 = vld [vmem:[%s559_s9] sm:$0xff] }
   0xe   :  { %231 = vmatpush.msra.mxu2 %v206_v49  ;;  %v340_v50 = vld [vmem:[%s556_s6] ss:$0 sm:$0xff] }
   0xf   :  { %v342_v17 = vld [vmem:[%s558_s8] ss:$0 sm:$0xff] }
  0x10   :  { %v348_v6 = vpop.eup %347 }
  0x11   :  { %v98_v8 = vmul.f32 8.0, %v348_v6  ;;  %vm102_vm2 = vweird.f32 %v348_v6 }
  0x13   :  { %v99_v12 = vsub.f32 1.0, %v98_v8 }
  0x15   :  { %v100_v15 = vmul.f32 %v348_v6, %v99_v12 }
  0x17   :  { %v101_v20 = vadd.f32 %v348_v6, %v100_v15 }
  0x19   :  { %v493_v23 = vsel %vm102_vm2, %v348_v6, %v101_v20 }
  0x87   :  { %v85_v9 = vpop.f32.mrf.mxu0 }
  0x88   :  { %v86_v10 = vadd.f32 %v337_v7, %v85_v9 }
  0x8a   :  { %v88_v11 = vmax.f32 %v86_v10, 0.0 }
  0x8c   :  { %v90_v13 = vsel %vm89_vm1, %v88_v11, 0.0 }
  0x8d   :  { %v91_v14 = vrot.slane %v90_v13, 4 }
  0x8f   :  { %v92_v16 = vadd.f32 %v91_v14, %v90_v13  ;;  %v341_v13 = vld [vmem:[%s557_s7] ss:$0 sm:$0xff] }
  0x91   :  { %v93_v19 = vrot.slane %v92_v16, 2 }
  0x93   :  { %v94_v21 = vadd.f32 %v93_v19, %v92_v16 }
  0x95   :  { %v95_v22 = vrot.slane %v94_v21, 1 }
  0x97   :  { %v96_v24 = vadd.f32 %v95_v22, %v94_v21  ;;  %v343_v21 = vld [vmem:[%s560_s10] ss:$0 sm:$0xff] }
  0x99   :  { %v104_v25 = vmul.f32 %v493_v23, %v96_v24 }
  0x9b   :  { %v105_v26 = vsub.f32 %v88_v11, %v104_v25 }
  0x9d   :  { %v106_v27 = vmul.f32 %v105_v26, %v105_v26  ;;  %v118_v44 = vmul.f32 %v338_v41, %v105_v26 }
  0x9f   :  { %v107_v28 = vsel %vm89_vm1, %v106_v27, 0.0 }
  0xa0   :  { %v108_v29 = vrot.slane %v107_v28, 4 }
  0xa2   :  { %v109_v30 = vadd.f32 %v108_v29, %v107_v28  ;;  %v276_v29 = vld [vmem:[%s563_s13] sm:$0x3] }
  0xa3   :  { %333 = vmatpush.msk.msra.mxu3 %vm285_vm11, %v276_v29 }
  0xa4   :  { %v110_v31 = vrot.slane %v109_v30, 2 }
  0xa6   :  { %v111_v32 = vadd.f32 %v110_v31, %v109_v30 }
  0xa8   :  { %v112_v33 = vrot.slane %v111_v32, 1 }
  0xaa   :  { %v113_v34 = vadd.f32 %v112_v33, %v111_v32 }
  0xac   :  { %v114_v35 = vmul.f32 %v113_v34, %v493_v23 }
  0xae   :  { %v119_v36 = vadd.f32 1e-05, %v114_v35 }
  0xb0   :  { %349 = vrsqrt.f32 %v119_v36  ;;  %vm126_vm4 = vweird.f32 %v119_v36 }
  0xb6   :  { %v350_v37 = vpop.eup %349 }
  0xb7   :  { %v121_v38 = vmul.f32 %v350_v37, %v119_v36  ;;  %vm127_vm3 = vweird.f32 %v350_v37 }
  0xb8   :  { %vm128_vm5 = vmor %vm126_vm4, %vm127_vm3 }
  0xb9   :  { %v122_v39 = vmul.f32 %v350_v37, %v121_v38 }
  0xbb   :  { %v123_v40 = vmul.f32 0.5, %v122_v39 }
  0xbd   :  { %v124_v42 = vsub.f32 1.5, %v123_v40 }
  0xbf   :  { %v125_v43 = vmul.f32 %v350_v37, %v124_v42 }
  0xc1   :  { %v129_v46 = vsel %vm128_vm5, %v350_v37, %v125_v43 }
  0xc2   :  { %v130_v47 = vmul.f32 %v129_v46, %v118_v44 }
  0xc4   :  { %v134_v48 = vadd.f32 %v339_v45, %v130_v47 }
  0xc6   :  { %331 = vmatmul.msk.f32.vlgmr.msra.gmra.mxu1 %vm89_vm1, %v134_v48 }
 0x143   :  { %v163_v51 = vpop.f32.mrf.mxu1 }
 0x144   :  { %v164_v52 = vadd.f32 %v340_v50, %v163_v51  ;;  %v344_v50 = vld [vmem:[%s561_s11] ss:$0 sm:$0xff] }
 0x146   :  { %v166_v53 = vmax.f32 %v164_v52, 0.0 }
 0x148   :  { %v168_v54 = vsel %vm167_vm6, %v166_v53, 0.0 }
 0x149   :  { %v169_v55 = vrot.slane %v168_v54, 4 }
 0x14b   :  { %v170_v56 = vadd.f32 %v169_v55, %v168_v54 }
 0x14d   :  { %v171_v57 = vrot.slane %v170_v56, 2 }
 0x14f   :  { %v172_v58 = vadd.f32 %v171_v57, %v170_v56  ;;  %v346_v57 = vld [vmem:[%s564_s14] ss:$0 sm:$0xff] }
 0x151   :  { %v173_v59 = vrot.slane %v172_v58, 1 }
 0x153   :  { %v174_v60 = vadd.f32 %v173_v59, %v172_v58 }
 0x155   :  { %v175_v61 = vmul.f32 %v174_v60, %v493_v23 }
 0x157   :  { %v176_v62 = vsub.f32 %v166_v53, %v175_v61 }
 0x159   :  { %v177_v63 = vmul.f32 %v176_v62, %v176_v62  ;;  %v189_v16 = vmul.f32 %v341_v13, %v176_v62 }
 0x15b   :  { %v178_v0 = vsel %vm167_vm6, %v177_v63, 0.0 }
 0x15c   :  { %v179_v1 = vrot.slane %v178_v0, 4 }
 0x15e   :  { %v180_v2 = vadd.f32 %v179_v1, %v178_v0 }
 0x160   :  { %v181_v3 = vrot.slane %v180_v2, 2 }
 0x162   :  { %v182_v4 = vadd.f32 %v181_v3, %v180_v2 }
 0x164   :  { %v183_v5 = vrot.slane %v182_v4, 1 }
 0x166   :  { %v184_v6 = vadd.f32 %v183_v5, %v182_v4 }
 0x168   :  { %v185_v7 = vmul.f32 %v184_v6, %v493_v23 }
 0x16a   :  { %v190_v8 = vadd.f32 1e-05, %v185_v7 }
 0x16c   :  { %351 = vrsqrt.f32 %v190_v8  ;;  %vm197_vm8 = vweird.f32 %v190_v8 }
 0x172   :  { %v352_v9 = vpop.eup %351 }
 0x173   :  { %v192_v10 = vmul.f32 %v352_v9, %v190_v8  ;;  %vm198_vm7 = vweird.f32 %v352_v9 }
 0x174   :  { %vm199_vm9 = vmor %vm197_vm8, %vm198_vm7 }
 0x175   :  { %v193_v11 = vmul.f32 %v352_v9, %v192_v10 }
 0x177   :  { %v194_v12 = vmul.f32 0.5, %v193_v11 }
 0x179   :  { %v195_v14 = vsub.f32 1.5, %v194_v12 }
 0x17b   :  { %v196_v15 = vmul.f32 %v352_v9, %v195_v14 }
 0x17d   :  { %v200_v18 = vsel %vm199_vm9, %v352_v9, %v196_v15 }
 0x17e   :  { %v201_v19 = vmul.f32 %v200_v18, %v189_v16 }
 0x180   :  { %v205_v20 = vadd.f32 %v342_v17, %v201_v19 }
 0x182   :  { %332 = vmatmul.msk.f32.vlgmr.msra.gmra.mxu2 %vm167_vm6, %v205_v20 }
 0x205   :  { %v233_v22 = vpop.f32.mrf.mxu2 }
 0x206   :  { %v234_v24 = vadd.f32 %v343_v21, %v233_v22 }
 0x208   :  { %v236_v25 = vmax.f32 %v234_v24, 0.0 }
 0x20a   :  { %v238_v26 = vsel %vm237_vm10, %v236_v25, 0.0 }
 0x20b   :  { %v239_v27 = vrot.slane %v238_v26, 4 }
 0x20d   :  { %v240_v28 = vadd.f32 %v239_v27, %v238_v26 }
 0x20f   :  { %v241_v30 = vrot.slane %v240_v28, 2 }
 0x211   :  { %v242_v31 = vadd.f32 %v241_v30, %v240_v28 }
 0x213   :  { %v243_v32 = vrot.slane %v242_v31, 1 }
 0x215   :  { %v244_v33 = vadd.f32 %v243_v32, %v242_v31 }
 0x217   :  { %v245_v34 = vmul.f32 %v244_v33, %v493_v23 }
 0x219   :  { %v246_v35 = vsub.f32 %v236_v25, %v245_v34 }
 0x21b   :  { %v247_v36 = vmul.f32 %v246_v35, %v246_v35  ;;  %v259_v53 = vmul.f32 %v344_v50, %v246_v35 }
 0x21d   :  { %v248_v37 = vsel %vm237_vm10, %v247_v36, 0.0 }
 0x21e   :  { %v249_v38 = vrot.slane %v248_v37, 4 }
 0x220   :  { %v250_v39 = vadd.f32 %v249_v38, %v248_v37 }
 0x222   :  { %v251_v40 = vrot.slane %v250_v39, 2 }
 0x224   :  { %v252_v41 = vadd.f32 %v251_v40, %v250_v39 }
 0x226   :  { %v253_v42 = vrot.slane %v252_v41, 1 }
 0x228   :  { %v254_v43 = vadd.f32 %v253_v42, %v252_v41 }
 0x22a   :  { %v255_v44 = vmul.f32 %v254_v43, %v493_v23  ;;  %v345_v23 = vld [vmem:[%s562_s12] ss:$0 sm:$0xff]  ;;  %s317_s12 = sshll.u32 %s565_s15, 4  ;;  %s318_s12 = int_to_ptr.hbm [resolvable:$true] %s317_s12 }
 0x22c   :  { %v260_v45 = vadd.f32 1e-05, %v255_v44 }
 0x22e   :  { %353 = vrsqrt.f32 %v260_v45  ;;  %vm267_vm13 = vweird.f32 %v260_v45 }
 0x234   :  { %v354_v46 = vpop.eup %353 }
 0x235   :  { %v262_v47 = vmul.f32 %v354_v46, %v260_v45  ;;  %vm268_vm12 = vweird.f32 %v354_v46 }
 0x236   :  { %vm269_vm14 = vmor %vm267_vm13, %vm268_vm12 }
 0x237   :  { %v263_v48 = vmul.f32 %v354_v46, %v262_v47 }
 0x239   :  { %v264_v49 = vmul.f32 0.5, %v263_v48 }
 0x23b   :  { %v265_v51 = vsub.f32 1.5, %v264_v49 }
 0x23d   :  { %v266_v52 = vmul.f32 %v354_v46, %v265_v51 }
 0x23f   :  { %v270_v54 = vsel %vm269_vm14, %v354_v46, %v266_v52 }
 0x240   :  { %v271_v55 = vmul.f32 %v270_v54, %v259_v53 }
 0x242   :  { %v275_v56 = vadd.f32 %v345_v23, %v271_v55 }
 0x244   :  { %278 = vst.msk [vmem:[%s566_s16] sm:$0xff] %vm237_vm10, %v275_v56  ;;  %334 = vmatmul.msk.f32.vlgmr.msra.gmra.mxu3 %vm237_vm10, %v275_v56 }
 0x2c7   :  { %v306_v58 = vpop.f32.mrf.mxu3 }
 0x2c8   :  { %v307_v59 = vadd.f32 %v346_v57, %v306_v58 }
 0x2ca   :  { %309 = vst.msk [vmem:[#allocation2] sm:$0xff] %vm89_vm1, %v307_v59 }
 0x2cb   :  { %320 = dma.vmem_to_hbm [thread:$0]  %s316_s20, 128, %s318_s12, [#allocation3]  }
 0x2cc   :  { %379 = dma.done.wait [#allocation3], 128  }
 0x2cd   :  { %380 = vsyncadd [#allocation3], 4294967168 }
 0x2ce   :  { %329 = vsyncpa [#allocation3], 1 }

</bundles_post_ra>
